<compile_context>
chip_gen: v7x
topology: tpu7x:2x2x1
jax: 0.10.0
libtpu: 0.0.40
codegen_flags: <defaults>
</compile_context>

<pallas_src>
import functools
import math

import numpy as np
import jax
import jax.numpy as jnp
from jax.experimental import pallas as pl
from jax.experimental.pallas import tpu as pltpu

# ----------------------------- model hyper-parameters -----------------------------
KERNEL_SIZE = 3
INPUT_CHANNELS = 4
F1 = 8                        # number of regular-representation fields
GROUP_ORDER = 8               # C8
COUT = F1 * GROUP_ORDER       # 64 conv output channels (group-major: co = g*F1 + f)
KK = KERNEL_SIZE * KERNEL_SIZE
KDIM = INPUT_CHANNELS * KK    # 36 contraction entries, k = (di*3+dj)*C + c  (no pad/bias rows)
TARGET_TM = 2048              # target output pixels per grid step
LANE_CHUNK = 256              # lanes per inner dot/pool chunk (acc stays ~16 vregs)


# ----------------------------- equivariant weight construction --------------------
def _rotation_matrix(k: int, angle: float) -> np.ndarray:
    """(k*k, k*k) bilinear-interpolation matrix rotating a k x k filter by `angle`."""
    c0 = (k - 1) / 2.0
    r = np.zeros((k * k, k * k), dtype=np.float64)
    ca, sa = math.cos(angle), math.sin(angle)
    for i in range(k):
        for j in range(k):
            yc, xc = i - c0, j - c0
            sx = ca * xc + sa * yc + c0
            sy = -sa * xc + ca * yc + c0
            x0, y0 = math.floor(sx), math.floor(sy)
            for dy in (0, 1):
                for dx in (0, 1):
                    yy, xx = y0 + dy, x0 + dx
                    wy = 1.0 - abs(sy - yy)
                    wx = 1.0 - abs(sx - xx)
                    if wy <= 0.0 or wx <= 0.0:
                        continue
                    if 0 <= yy < k and 0 <= xx < k:
                        r[i * k + j, yy * k + xx] += wy * wx
    return r


def build_c8_weights(key):
    """Returns wt (COUT, KDIM) f32 (C8-rotated filter bank, row co = g*F1+f) and bias (F1, 1)."""
    kb, kbias = jax.random.split(key)
    base = jax.random.normal(kb, (F1, INPUT_CHANNELS, KERNEL_SIZE, KERNEL_SIZE),
                             dtype=jnp.float32) * 0.1
    bias_f = np.asarray(jax.random.normal(kbias, (F1,), dtype=jnp.float32) * 0.01)

    base_np = np.asarray(base).reshape(F1, INPUT_CHANNELS, KK)
    wt = np.zeros((COUT, KDIM), dtype=np.float32)
    for g in range(GROUP_ORDER):
        rot = _rotation_matrix(KERNEL_SIZE, 2.0 * math.pi * g / GROUP_ORDER)
        rotated = base_np @ rot.T                           # (F1, Cin, KK)
        for f in range(F1):
            co = g * F1 + f                                 # group-major output channel
            wt[co, :] = rotated[f].T.reshape(KDIM)          # k = kk*C + c
    return jnp.asarray(wt), jnp.asarray(bias_f).reshape(F1, 1)


# ----------------------------- Pallas kernel --------------------------------------
def _c8_fused_kernel(xs_ref, w_ref, b_ref, o_ref, xcat_ref, *, tm, img_w, lc):
    # xs_ref  : (C, SLAB)    f32  row-flattened input slab (1-row halo, 1-elem slack, 128-padded)
    # w_ref   : (COUT, KDIM) bf16 C8-rotated filter bank (resident; rows group-major)
    # b_ref   : (F1, 1)      f32  per-field bias (shared across the 8 rotations -> added post-pool)
    # o_ref   : (F1, TM)     f32  group-pooled output block (lane-dense, NCHW-compatible slab)
    # xcat_ref: (KDIM, TM)   f32  VMEM scratch holding the fused-im2col patch tile (K on sublanes)

    # Column masks for the un-padded W dimension (hoisted; each tap's where reuses them).
    col = jax.lax.broadcasted_iota(jnp.int32, (1, tm), 1) % img_w
    not_left = jnp.broadcast_to(col != 0, (INPUT_CHANNELS, tm))
    not_right = jnp.broadcast_to(col != img_w - 1, (INPUT_CHANNELS, tm))

    # Fused im2col: 9 statically shifted slices of the slab build the (36, TM) patch tile in VMEM.
    for di in range(KERNEL_SIZE):
        for dj in range(KERNEL_SIZE):
            k0 = (di * KERNEL_SIZE + dj) * INPUT_CHANNELS
            start = di * img_w + dj                         # static offset into the slab
            vals = xs_ref[:, start:start + tm]              # (C, TM) shifted tap
            if dj == 0:
                vals = jnp.where(not_left, vals, 0.0)       # dj=0 at col 0 reads previous row
            elif dj == KERNEL_SIZE - 1:
                vals = jnp.where(not_right, vals, 0.0)      # dj=2 at col W-1 reads next row
            xcat_ref[k0:k0 + INPUT_CHANNELS, :] = vals

    wv = w_ref[...]                                         # (64, 36) bf16, resident
    bias = b_ref[...]                                       # (8, 1)  f32

    # Lane-chunked lifting conv + C8 group pooling.  Per chunk the f32 accumulator is only
    # (64, LC) = 16 vregs at LC=256, so nothing spills; ReLU/bias run on the pooled (8, LC) only.
    for c0 in range(0, tm, lc):                             # static, fully unrolled
        rhs = xcat_ref[:, c0:c0 + lc].astype(jnp.bfloat16)  # bf16 MXU input, f32 accumulate
        acc = jnp.dot(wv, rhs, preferred_element_type=jnp.float32)     # (64, LC)
        # Group-major rows: each 8-row slice is sublane-aligned -> 7 plain VPU maxes.
        pooled = acc[0:F1, :]
        for g in range(1, GROUP_ORDER):
            pooled = jnp.maximum(pooled, acc[g * F1:(g + 1) * F1, :])
        # bias + ReLU after the pool (both commute with max over the group copies).
        o_ref[:, c0:c0 + lc] = jnp.maximum(pooled + bias, 0.0)


# ----------------------------- tiling / wrapper ------------------------------------
def _round_up(v, m):
    return ((v + m - 1) // m) * m


def _pick_row_tile(n_img, h, w, target_tm=TARGET_TM):
    """Largest row tile TH dividing H with TH*W 128-aligned (or whole-image fallback).

    Prefers >= 2 tiles total and an EVEN tile count (two v7x TensorCores), then the largest
    tile not exceeding target_tm.
    """
    best, best_score = None, None
    for th in range(1, h + 1):
        if h % th:
            continue
        tm = th * w
        tpi = h // th
        if tm % 128 != 0 and tpi != 1:
            continue                       # output block lane dim must be 128-aligned unless full
        n_tiles = n_img * tpi
        score = (
            n_tiles >= 2,                  # keep both TensorCores busy when possible
            n_tiles % 2 == 0,              # even split across 2 TCs (v7x)
            tm <= target_tm,
            tm if tm <= target_tm else -tm,
        )
        if best_score is None or score > best_score:
            best_score, best = score, th
    return best


def _pick_lane_chunk(tm):
    for lcand in (LANE_CHUNK, 128):
        if tm % lcand == 0:
            return lcand
    return tm                              # single-tile fallback for 128-unfriendly H*W


def c8_invariant_cnn_forward(x, wt, bias):
    """x: (N, 4, H, W) f32 NCHW  ->  (N, 8, H, W) f32 NCHW."""
    n, c, h, w = x.shape
    assert c == INPUT_CHANNELS
    th = _pick_row_tile(n, h, w)
    tm = th * w                             # output pixels (= patch rows) per grid step
    tpi = h // th                           # row tiles per image
    lc = _pick_lane_chunk(tm)
    assert tm % lc == 0
    slab_len = _round_up(tm + 2 * w + 2, 128)   # TH rows + halo row above/below + slack, 128-aligned

    # Input prep (glue; fuses under jit): pad H by 1, flatten rows, add slack, cut per-tile slabs
    # with halo.  Extra HBM traffic is ~input-sized, not patch-sized.
    xpad = jnp.pad(x.astype(jnp.float32), ((0, 0), (0, 0), (1, 1), (0, 0)))   # (N, C, H+2, W)
    xflat = xpad.reshape(n, c, (h + 2) * w)
    flat_len_left = (h + 2) * w + 1
    pad_right = (tpi - 1) * tm + slab_len - flat_len_left
    xflat = jnp.pad(xflat, ((0, 0), (0, 0), (1, pad_right)))                  # (N, C, Lf)
    slabs = [xflat[:, :, t * tm: t * tm + slab_len] for t in range(tpi)]
    xslab = jnp.stack(slabs, axis=1)                                          # (N, TPI, C, SLAB)

    wt_bf = wt.astype(jnp.bfloat16)         # bf16 filter bank for the MXU (accumulation stays f32)

    # Scoped-VMEM headroom only matters for the huge single-tile fallback.
    vmem_need = (2 * c * slab_len * 4 + KDIM * tm * 4 + 2 * F1 * tm * 4 + COUT * KDIM * 2 + 256)
    cp_kwargs = dict(dimension_semantics=("parallel", "parallel"))
    if vmem_need > 12 * 1024 * 1024:
        cp_kwargs["vmem_limit_bytes"] = int(vmem_need * 1.5)

    kernel = functools.partial(_c8_fused_kernel, tm=tm, img_w=w, lc=lc)
    out = pl.pallas_call(
        kernel,
        out_shape=jax.ShapeDtypeStruct((n, F1, h * w), jnp.float32),
        grid_spec=pltpu.PrefetchScalarGridSpec(
            num_scalar_prefetch=0,
            grid=(n, tpi),
            in_specs=[
                pl.BlockSpec((None, None, c, slab_len), lambda i, j: (i, j, 0, 0)),  # pipelined slab
                pl.BlockSpec((COUT, KDIM), lambda i, j: (0, 0)),                     # resident weights
                pl.BlockSpec((F1, 1), lambda i, j: (0, 0)),                          # resident bias
            ],
            out_specs=pl.BlockSpec((None, F1, tm), lambda i, j: (i, 0, j)),          # NCHW-flat, lane-dense
            scratch_shapes=[pltpu.VMEM((KDIM, tm), jnp.float32)],
        ),
        compiler_params=pltpu.CompilerParams(**cp_kwargs),
    )(xslab, wt_bf, bias)

    return out.reshape(n, F1, h, w)          # pure reshape, no transpose pass


# ----------------------------- reference (plain JAX, f32) --------------------------
def _reference(x, wt, bias):
    n, c, h, w = x.shape
    xp = jnp.pad(x, ((0, 0), (0, 0), (1, 1), (1, 1)))
    cols = []
    for di in range(KERNEL_SIZE):
        for dj in range(KERNEL_SIZE):
            for cc in range(INPUT_CHANNELS):                 # column order k = (di*3+dj)*C + cc
                cols.append(xp[:, cc, di:di + h, dj:dj + w].reshape(-1))
    p = jnp.stack(cols, axis=1)                              # (M, 36)
    acc = p @ wt.T + jnp.tile(bias[:, 0], GROUP_ORDER)[None, :]   # conv + per-channel bias
    acc = jnp.maximum(acc, 0.0)                              # ReLU (original op order)
    pooled = acc.reshape(-1, GROUP_ORDER, F1).max(axis=1)    # max over the group copies
    return jnp.transpose(pooled.reshape(n, h, w, F1), (0, 3, 1, 2))


# TODO(synk): BaseC8InvariantCNN.forward is abstract; this implements the canonical
# lifting-conv -> ReLU -> C8 group-pool forward of its concrete subclasses.  The escnn
# GeometricTensor wrapper and state_dict/pickle plumbing are host-side glue with no kernel role.

if __name__ == "__main__":
    key = jax.random.PRNGKey(0)
    kx, kw = jax.random.split(key)

    N, C, H, W = 2, 4, 16, 16
    x = jax.random.normal(kx, (N, C, H, W), dtype=jnp.float32)
    wt, bias = build_c8_weights(kw)

    fwd = jax.jit(c8_invariant_cnn_forward)
    out = jax.block_until_ready(fwd(x, wt, bias))

    ref = _reference(x, wt, bias)
    assert out.shape == (N, F1, H, W)
    # bf16 MXU inputs (f32 accumulation): a few e-3 of rounding error is expected vs the f32 ref.
    err = float(jnp.max(jnp.abs(out - ref)))
    assert jnp.allclose(out, ref, atol=1e-2, rtol=1e-2), err

    print("KERNEL_OK")
</pallas_src>

<mosaic_0001>
module attributes {stable_mosaic.version = 11 : i64} {
  func.func @_c8_fused_kernel(%arg0: i32, %arg1: i32, %arg2: memref<1x1x4x384xf32, #tpu.memory_space<vmem>>, %arg3: memref<64x36xbf16, #tpu.memory_space<vmem>>, %arg4: memref<8x1xf32, #tpu.memory_space<vmem>>, %arg5: memref<1x8x256xf32, #tpu.memory_space<vmem>>, %arg6: memref<36x256xf32, #tpu.memory_space<vmem>>) attributes {dimension_semantics = [#tpu.dimension_semantics<parallel>, #tpu.dimension_semantics<parallel>], iteration_bounds = array<i64: 2, 1>, scalar_prefetch = 0 : i64, scratch_operands = 1 : i64, tpu.core_type = #tpu.core_type<tc>, window_params = [{transform_indices = @transform_0, window_bounds = array<i64: 1, 1, 4, 384>}, {pipeline_mode = #tpu.pipeline_mode<synchronous>, transform_indices = @transform_1, window_bounds = array<i64: 64, 36>}, {pipeline_mode = #tpu.pipeline_mode<synchronous>, transform_indices = @transform_2, window_bounds = array<i64: 8, 1>}, {transform_indices = @transform_3, window_bounds = array<i64: 1, 8, 256>}]} {
    %0 = tpu.iota {dimensions = array<i32: 1>} : vector<1x256xi32>
    %c16_i32 = arith.constant 16 : i32
    %c0_i32 = arith.constant 0 : i32
    %1 = arith.cmpi eq, %c16_i32, %c0_i32 : i32
    %c1_i32 = arith.constant 1 : i32
    %2 = arith.select %1, %c1_i32, %c16_i32 : i32
    %3 = vector.broadcast %2 : i32 to vector<1x256xi32>
    %4 = arith.remsi %0, %3 : vector<1x256xi32>
    %c0_i32_0 = arith.constant 0 : i32
    %5 = vector.broadcast %c0_i32_0 : i32 to vector<1x256xi32>
    %6 = arith.cmpi ne, %4, %5 : vector<1x256xi32>
    %c0_i32_1 = arith.constant 0 : i32
    %7 = vector.broadcast %c0_i32_1 : i32 to vector<1x256xi32>
    %8 = arith.cmpi slt, %4, %7 : vector<1x256xi32>
    %c0_i32_2 = arith.constant 0 : i32
    %9 = arith.cmpi slt, %2, %c0_i32_2 : i32
    %10 = vector.broadcast %9 : i1 to vector<1x256xi1>
    %11 = vector.broadcast %10 : vector<1x256xi1> to vector<1x256xi1>
    %12 = arith.xori %8, %11 : vector<1x256xi1>
    %13 = arith.andi %12, %6 : vector<1x256xi1>
    %14 = vector.broadcast %2 : i32 to vector<1x256xi32>
    %15 = arith.addi %4, %14 : vector<1x256xi32>
    %16 = arith.select %13, %15, %4 : vector<1x256xi1>, vector<1x256xi32>
    %c0_i32_3 = arith.constant 0 : i32
    %17 = vector.broadcast %c0_i32_3 : i32 to vector<1x256xi32>
    %18 = arith.cmpi ne, %16, %17 : vector<1x256xi32>
    %19 = vector.shape_cast %18 : vector<1x256xi1> to vector<1x256xi1>
    %20 = vector.broadcast %19 : vector<1x256xi1> to vector<4x256xi1>
    %c15_i32 = arith.constant 15 : i32
    %21 = vector.broadcast %c15_i32 : i32 to vector<1x256xi32>
    %22 = arith.cmpi ne, %16, %21 : vector<1x256xi32>
    %23 = vector.shape_cast %22 : vector<1x256xi1> to vector<1x256xi1>
    %24 = vector.broadcast %23 : vector<1x256xi1> to vector<4x256xi1>
    %c0 = arith.constant 0 : index
    %c0_4 = arith.constant 0 : index
    %c0_5 = arith.constant 0 : index
    %c0_6 = arith.constant 0 : index
    %25 = vector.load %arg2[%c0, %c0_4, %c0_5, %c0_6] : memref<1x1x4x384xf32, #tpu.memory_space<vmem>>, vector<1x1x4x256xf32>
    %26 = vector.shape_cast %25 : vector<1x1x4x256xf32> to vector<4x256xf32>
    %cst = arith.constant 0.000000e+00 : f32
    %27 = vector.broadcast %cst : f32 to vector<4x256xf32>
    %28 = arith.select %20, %26, %27 : vector<4x256xi1>, vector<4x256xf32>
    %c0_7 = arith.constant 0 : index
    %c0_8 = arith.constant 0 : index
    %29 = vector.load %arg6[%c0_7, %c0_8] : memref<36x256xf32, #tpu.memory_space<vmem>>, vector<4x256xf32>
    tpu.vector_store %arg6[%c0_7, %c0_8], %28 {strides = array<i32>} : memref<36x256xf32, #tpu.memory_space<vmem>>, vector<4x256xf32>,
    %c0_9 = arith.constant 0 : index
    %c0_10 = arith.constant 0 : index
    %c0_11 = arith.constant 0 : index
    %c1 = arith.constant 1 : index
    %30 = vector.load %arg2[%c0_9, %c0_10, %c0_11, %c1] : memref<1x1x4x384xf32, #tpu.memory_space<vmem>>, vector<1x1x4x256xf32>
    %31 = vector.shape_cast %30 : vector<1x1x4x256xf32> to vector<4x256xf32>
    %c4 = arith.constant 4 : index
    %c0_12 = arith.constant 0 : index
    %32 = vector.load %arg6[%c4, %c0_12] : memref<36x256xf32, #tpu.memory_space<vmem>>, vector<4x256xf32>
    tpu.vector_store %arg6[%c4, %c0_12], %31 {strides = array<i32>} : memref<36x256xf32, #tpu.memory_space<vmem>>, vector<4x256xf32>,
    %c0_13 = arith.constant 0 : index
    %c0_14 = arith.constant 0 : index
    %c0_15 = arith.constant 0 : index
    %c2 = arith.constant 2 : index
    %33 = vector.load %arg2[%c0_13, %c0_14, %c0_15, %c2] : memref<1x1x4x384xf32, #tpu.memory_space<vmem>>, vector<1x1x4x256xf32>
    %34 = vector.shape_cast %33 : vector<1x1x4x256xf32> to vector<4x256xf32>
    %cst_16 = arith.constant 0.000000e+00 : f32
    %35 = vector.broadcast %cst_16 : f32 to vector<4x256xf32>
    %36 = arith.select %24, %34, %35 : vector<4x256xi1>, vector<4x256xf32>
    %c8 = arith.constant 8 : index
    %c0_17 = arith.constant 0 : index
    %37 = vector.load %arg6[%c8, %c0_17] : memref<36x256xf32, #tpu.memory_space<vmem>>, vector<4x256xf32>
    tpu.vector_store %arg6[%c8, %c0_17], %36 {strides = array<i32>} : memref<36x256xf32, #tpu.memory_space<vmem>>, vector<4x256xf32>,
    %c0_18 = arith.constant 0 : index
    %c0_19 = arith.constant 0 : index
    %c0_20 = arith.constant 0 : index
    %c16 = arith.constant 16 : index
    %38 = vector.load %arg2[%c0_18, %c0_19, %c0_20, %c16] : memref<1x1x4x384xf32, #tpu.memory_space<vmem>>, vector<1x1x4x256xf32>
    %39 = vector.shape_cast %38 : vector<1x1x4x256xf32> to vector<4x256xf32>
    %cst_21 = arith.constant 0.000000e+00 : f32
    %40 = vector.broadcast %cst_21 : f32 to vector<4x256xf32>
    %41 = arith.select %20, %39, %40 : vector<4x256xi1>, vector<4x256xf32>
    %c12 = arith.constant 12 : index
    %c0_22 = arith.constant 0 : index
    %42 = vector.load %arg6[%c12, %c0_22] : memref<36x256xf32, #tpu.memory_space<vmem>>, vector<4x256xf32>
    tpu.vector_store %arg6[%c12, %c0_22], %41 {strides = array<i32>} : memref<36x256xf32, #tpu.memory_space<vmem>>, vector<4x256xf32>,
    %c0_23 = arith.constant 0 : index
    %c0_24 = arith.constant 0 : index
    %c0_25 = arith.constant 0 : index
    %c17 = arith.constant 17 : index
    %43 = vector.load %arg2[%c0_23, %c0_24, %c0_25, %c17] : memref<1x1x4x384xf32, #tpu.memory_space<vmem>>, vector<1x1x4x256xf32>
    %44 = vector.shape_cast %43 : vector<1x1x4x256xf32> to vector<4x256xf32>
    %c16_26 = arith.constant 16 : index
    %c0_27 = arith.constant 0 : index
    %45 = vector.load %arg6[%c16_26, %c0_27] : memref<36x256xf32, #tpu.memory_space<vmem>>, vector<4x256xf32>
    tpu.vector_store %arg6[%c16_26, %c0_27], %44 {strides = array<i32>} : memref<36x256xf32, #tpu.memory_space<vmem>>, vector<4x256xf32>,
    %c0_28 = arith.constant 0 : index
    %c0_29 = arith.constant 0 : index
    %c0_30 = arith.constant 0 : index
    %c18 = arith.constant 18 : index
    %46 = vector.load %arg2[%c0_28, %c0_29, %c0_30, %c18] : memref<1x1x4x384xf32, #tpu.memory_space<vmem>>, vector<1x1x4x256xf32>
    %47 = vector.shape_cast %46 : vector<1x1x4x256xf32> to vector<4x256xf32>
    %cst_31 = arith.constant 0.000000e+00 : f32
    %48 = vector.broadcast %cst_31 : f32 to vector<4x256xf32>
    %49 = arith.select %24, %47, %48 : vector<4x256xi1>, vector<4x256xf32>
    %c20 = arith.constant 20 : index
    %c0_32 = arith.constant 0 : index
    %50 = vector.load %arg6[%c20, %c0_32] : memref<36x256xf32, #tpu.memory_space<vmem>>, vector<4x256xf32>
    tpu.vector_store %arg6[%c20, %c0_32], %49 {strides = array<i32>} : memref<36x256xf32, #tpu.memory_space<vmem>>, vector<4x256xf32>,
    %c0_33 = arith.constant 0 : index
    %c0_34 = arith.constant 0 : index
    %c0_35 = arith.constant 0 : index
    %c32 = arith.constant 32 : index
    %51 = vector.load %arg2[%c0_33, %c0_34, %c0_35, %c32] : memref<1x1x4x384xf32, #tpu.memory_space<vmem>>, vector<1x1x4x256xf32>
    %52 = vector.shape_cast %51 : vector<1x1x4x256xf32> to vector<4x256xf32>
    %cst_36 = arith.constant 0.000000e+00 : f32
    %53 = vector.broadcast %cst_36 : f32 to vector<4x256xf32>
    %54 = arith.select %20, %52, %53 : vector<4x256xi1>, vector<4x256xf32>
    %c24 = arith.constant 24 : index
    %c0_37 = arith.constant 0 : index
    %55 = vector.load %arg6[%c24, %c0_37] : memref<36x256xf32, #tpu.memory_space<vmem>>, vector<4x256xf32>
    tpu.vector_store %arg6[%c24, %c0_37], %54 {strides = array<i32>} : memref<36x256xf32, #tpu.memory_space<vmem>>, vector<4x256xf32>,
    %c0_38 = arith.constant 0 : index
    %c0_39 = arith.constant 0 : index
    %c0_40 = arith.constant 0 : index
    %c33 = arith.constant 33 : index
    %56 = vector.load %arg2[%c0_38, %c0_39, %c0_40, %c33] : memref<1x1x4x384xf32, #tpu.memory_space<vmem>>, vector<1x1x4x256xf32>
    %57 = vector.shape_cast %56 : vector<1x1x4x256xf32> to vector<4x256xf32>
    %c28 = arith.constant 28 : index
    %c0_41 = arith.constant 0 : index
    %58 = vector.load %arg6[%c28, %c0_41] : memref<36x256xf32, #tpu.memory_space<vmem>>, vector<4x256xf32>
    tpu.vector_store %arg6[%c28, %c0_41], %57 {strides = array<i32>} : memref<36x256xf32, #tpu.memory_space<vmem>>, vector<4x256xf32>,
    %c0_42 = arith.constant 0 : index
    %c0_43 = arith.constant 0 : index
    %c0_44 = arith.constant 0 : index
    %c34 = arith.constant 34 : index
    %59 = vector.load %arg2[%c0_42, %c0_43, %c0_44, %c34] : memref<1x1x4x384xf32, #tpu.memory_space<vmem>>, vector<1x1x4x256xf32>
    %60 = vector.shape_cast %59 : vector<1x1x4x256xf32> to vector<4x256xf32>
    %cst_45 = arith.constant 0.000000e+00 : f32
    %61 = vector.broadcast %cst_45 : f32 to vector<4x256xf32>
    %62 = arith.select %24, %60, %61 : vector<4x256xi1>, vector<4x256xf32>
    %c32_46 = arith.constant 32 : index
    %c0_47 = arith.constant 0 : index
    %63 = vector.load %arg6[%c32_46, %c0_47] : memref<36x256xf32, #tpu.memory_space<vmem>>, vector<4x256xf32>
    tpu.vector_store %arg6[%c32_46, %c0_47], %62 {strides = array<i32>} : memref<36x256xf32, #tpu.memory_space<vmem>>, vector<4x256xf32>,
    %c0_48 = arith.constant 0 : index
    %c0_49 = arith.constant 0 : index
    %64 = vector.load %arg3[%c0_48, %c0_49] : memref<64x36xbf16, #tpu.memory_space<vmem>>, vector<64x36xbf16>
    %c0_50 = arith.constant 0 : index
    %c0_51 = arith.constant 0 : index
    %65 = vector.load %arg4[%c0_50, %c0_51] : memref<8x1xf32, #tpu.memory_space<vmem>>, vector<8x1xf32>
    %c0_52 = arith.constant 0 : index
    %c0_53 = arith.constant 0 : index
    %66 = vector.load %arg6[%c0_52, %c0_53] : memref<36x256xf32, #tpu.memory_space<vmem>>, vector<36x256xf32>
    %67 = arith.truncf %66 : vector<36x256xf32> to vector<36x256xbf16>
    %cst_54 = arith.constant dense<0.000000e+00> : vector<64x256xf32>
    %68 = tpu.matmul %64, %67, %cst_54 {dimension_numbers = #tpu.dot_dimension_numbers<[1], [0], [0], [1], [0, 0, 1, 1], [], []>} : vector<64x36xbf16>, vector<36x256xbf16>, vector<64x256xf32> -> vector<64x256xf32>
    %69 = vector.extract_strided_slice %68 {offsets = [0, 0], sizes = [8, 256], strides = [1, 1]} : vector<64x256xf32> to vector<8x256xf32>
    %70 = vector.extract_strided_slice %68 {offsets = [8, 0], sizes = [8, 256], strides = [1, 1]} : vector<64x256xf32> to vector<8x256xf32>
    %71 = arith.maximumf %69, %70 : vector<8x256xf32>
    %72 = vector.extract_strided_slice %68 {offsets = [16, 0], sizes = [8, 256], strides = [1, 1]} : vector<64x256xf32> to vector<8x256xf32>
    %73 = arith.maximumf %71, %72 : vector<8x256xf32>
    %74 = vector.extract_strided_slice %68 {offsets = [24, 0], sizes = [8, 256], strides = [1, 1]} : vector<64x256xf32> to vector<8x256xf32>
    %75 = arith.maximumf %73, %74 : vector<8x256xf32>
    %76 = vector.extract_strided_slice %68 {offsets = [32, 0], sizes = [8, 256], strides = [1, 1]} : vector<64x256xf32> to vector<8x256xf32>
    %77 = arith.maximumf %75, %76 : vector<8x256xf32>
    %78 = vector.extract_strided_slice %68 {offsets = [40, 0], sizes = [8, 256], strides = [1, 1]} : vector<64x256xf32> to vector<8x256xf32>
    %79 = arith.maximumf %77, %78 : vector<8x256xf32>
    %80 = vector.extract_strided_slice %68 {offsets = [48, 0], sizes = [8, 256], strides = [1, 1]} : vector<64x256xf32> to vector<8x256xf32>
    %81 = arith.maximumf %79, %80 : vector<8x256xf32>
    %82 = vector.extract_strided_slice %68 {offsets = [56, 0], sizes = [8, 256], strides = [1, 1]} : vector<64x256xf32> to vector<8x256xf32>
    %83 = arith.maximumf %81, %82 : vector<8x256xf32>
    %84 = vector.broadcast %65 : vector<8x1xf32> to vector<8x256xf32>
    %85 = arith.addf %83, %84 : vector<8x256xf32>
    %cst_55 = arith.constant 0.000000e+00 : f32
    %86 = vector.broadcast %cst_55 : f32 to vector<8x256xf32>
    %87 = arith.maximumf %85, %86 : vector<8x256xf32>
    %c0_56 = arith.constant 0 : index
    %c0_57 = arith.constant 0 : index
    %c0_58 = arith.constant 0 : index
    %88 = vector.load %arg5[%c0_56, %c0_57, %c0_58] : memref<1x8x256xf32, #tpu.memory_space<vmem>>, vector<1x8x256xf32>
    %89 = vector.shape_cast %88 : vector<1x8x256xf32> to vector<8x256xf32>
    %90 = vector.shape_cast %87 : vector<8x256xf32> to vector<1x8x256xf32>
    tpu.vector_store %arg5[%c0_56, %c0_57, %c0_58], %90 {strides = array<i32>} : memref<1x8x256xf32, #tpu.memory_space<vmem>>, vector<1x8x256xf32>,
    return
  }
  func.func @transform_0(%arg0: i32, %arg1: i32) -> (i32, i32, i32, i32) {
    %c0_i32 = arith.constant 0 : i32
    %c0_i32_0 = arith.constant 0 : i32
    %c0_i32_1 = arith.constant 0 : i32
    return %arg0, %arg1, %c0_i32, %c0_i32_0 : i32, i32, i32, i32
  }
  func.func @transform_1(%arg0: i32, %arg1: i32) -> (i32, i32) {
    %c0_i32 = arith.constant 0 : i32
    %c0_i32_0 = arith.constant 0 : i32
    %c0_i32_1 = arith.constant 0 : i32
    return %c0_i32, %c0_i32_0 : i32, i32
  }
  func.func @transform_2(%arg0: i32, %arg1: i32) -> (i32, i32) {
    %c0_i32 = arith.constant 0 : i32
    %c0_i32_0 = arith.constant 0 : i32
    %c0_i32_1 = arith.constant 0 : i32
    return %c0_i32, %c0_i32_0 : i32, i32
  }
  func.func @transform_3(%arg0: i32, %arg1: i32) -> (i32, i32, i32) {
    %c0_i32 = arith.constant 0 : i32
    %c0_i32_0 = arith.constant 0 : i32
    return %arg0, %c0_i32, %arg1 : i32, i32, i32
  }
}

</mosaic_0001>

<bundles_post_ra>
// kernel: c8_invariant_cnn_forward.1
= control target key start
LH: loop header
LB: loop body
LE: loop exit
PB: predicated region body
PF: predicated region fallthrough
CT: control target
= control target key end

     0   :  { %s799_s12 = smov 0   ;;  %s801_s13 = smov 0   ;;  %s926_s0 = inlined_call_operand.vmem [shape: f32[2,1,4,384], index: 0, kind: input, shape index: {}]   ;;  %s927_s1 = inlined_call_operand.vmem [shape: bf16[64,36], index: 1, kind: input, shape index: {}]   ;;  %s928_s2 = inlined_call_operand.vmem [shape: f32[8,1], index: 2, kind: input, shape index: {}]   ;;  %s929_s3 = inlined_call_operand.vmem [shape: f32[2,8,256], index: 3, kind: output, shape index: {}]  }
   0x1   :  { %s803_s14 = smov 0  }
   0x2 LB: > { %s25_s15 = sadd.s32 1, %s764_s13  ;;  %p681_p0 = scmp.ge.s32.totalorder %s768_s14, 1  ;;  %s768_s14 = sphi %s803_s14, %s13_s14   ;;  %s764_s13 = sphi %s801_s13, %s939_s13   ;;  %s760_s12 = sphi %s799_s12, %s938_s12  }
   0x3   : > { %p27_p1 = scmp.ge.s32.totalorder %s25_s15, 2  ;;  %p157_p2 = scmp.lt.s32.totalorder %s768_s14, 3 }
   0x5   : > { %s941_s15 = smov (%p27_p1, %s25_s15), 0  ;;  %p158_p3 = pnand %p681_p0, %p157_p2 }
   0x6   : > { %p189_p4 = scmp.lt.s32.totalorder (!%p158_p3), %s760_s12, 1  ;;  %v209_v0 = vlaneseq (!%p158_p3)  ;;  %s770_s20 = smov (!%p158_p3), 112   ;;  %v778_v20 = vmov (!%p158_p3), 0   ;;  %v432_v21 = vld [vmem:[%s928_s2] sm:$0xff] (!%p158_p3)  ;;  %vm306_vm2 = vcmask (!%p158_p3), 916480   ;;  %vm286_vm3 = vcmask (!%p158_p3), 1031168  }
   0x7   : > { %161 = sbr.rel (%p158_p3) target bundleno = 432 (0x1b0), region = 32  ;;  %s771_s21 = smov (!%p158_p3), 126   ;;  %521 = vmatprep.mubr.bf16.mxu0 (!%p158_p3), %v778_v20  ;;  %541 = vmatprep.mubr.bf16.mxu1 (!%p158_p3), %v778_v20  ;;  %vm268_vm5 = vcmask (!%p158_p3), 1039360   ;;  %vm350_vm7 = vcmask (!%p158_p3), 900096   ;;  %vm376_vm8 = vcmask (!%p158_p3), 785408   ;;  %vm332_vm9 = vcmask (!%p158_p3), 908288  }
   0x8   : > { %v819_v1 = vand.u32 (!%p158_p3), 127, %v209_v0  ;;  %s772_s22 = smov (!%p158_p3), 127   ;;  %s773_s23 = smov (!%p158_p3), 110   ;;  %737 = vset.pattern.permute.xlu0 (!%p158_p3), %v778_v20  ;;  %vm397_vm10 = vcmask (!%p158_p3), 777216   ;;  %vm415_vm11 = vcmask (!%p158_p3), 769024   ;;  %vm482_vm12 = vcmask (!%p158_p3), 1041408  }
   0x9   : > { %s774_s24 = smov (!%p158_p3), 96   ;;  %s775_s25 = smov (!%p158_p3), 111   ;;  %v742_v26 = vld [vmem:[%s927_s1] sm:$0xff] (!%p158_p3)   ;;  %vm469_vm13 = vcmask (!%p158_p3), 293888  }
   0xa   : > { %v823_v2 = vadd.s32 (!%p158_p3), 128, %v819_v1  ;;  %v216_v3 = vand.u32 (!%p158_p3), 15, %v819_v1  ;;  %s776_s26 = smov (!%p158_p3), 95   ;;  %s777_s27 = smov (!%p158_p3), 94  }
   0xc   : > { %v223_v4 = vand.u32 (!%p158_p3), 15, %v823_v2  ;;  %vm836_vm0 = vcmp.ne.s32.totalorder (!%p158_p3), %v216_v3, 0  ;;  %vm874_vm6 = vcmp.ne.s32.totalorder (!%p158_p3), %v216_v3, 15 }
   0xe   : > { %s943_s12 = smov (!%p189_p4, %s760_s12), 1  ;;  %vm843_vm1 = vcmp.ne.s32.totalorder %v223_v4, 0  ;;  %vm861_vm4 = vcmp.ne.s32.totalorder %v223_v4, 15 }
   0xf   : > { %s703_s16 = smul.u32 12, %s943_s12  ;;  %s696_s11 = sshll.u32 %s943_s12, 4 }
  0x10   : > { %s206_s18 = scalar_lea.vmem %s929_s3, %s696_s11 }
  0x11   : > { %s829_s19 = scalar_lea.vmem %s926_s0, %s703_s16 }
  0x12   : > { %v296_v5 = vld [vmem:[%s829_s19 + $0x8] sm:$0xf]  ;;  %v295_v6 = vld [vmem:[%s829_s19] sm:$0xff] }
  0x13   : > { %304 = vrot.lane.b32.xlu0 %v296_v5, %s770_s20  ;;  %300 = vrot.lane.b32.xlu1 %v295_v6, %s770_s20  ;;  %v252_v8 = vsel %vm836_vm0, %v295_v6, 0.0  ;;  %v299_v9 = vcombine.high %v295_v6, %v295_v6  ;;  %v276_v10 = vld [vmem:[%s829_s19 + $0x8] sm:$0xf]  ;;  %v260_v14 = vcombine.low %v295_v6, %v295_v6 }
  0x14   : > { %254 = vst [vmem:[#allocation2] sm:$0xf] %v252_v8  ;;  %v740_v13 = vld [vmem:[%s829_s19 + $0x8] ss:$0 sps:$4 sm:$0xff]  }
  0x15   : > { %v253_v12 = vsel %vm843_vm1, %v299_v9, 0.0  ;;  %v340_v15 = vld [vmem:[%s829_s19 + $0x8] sm:$0xf] }
  0x16   : > { %255 = vst [vmem:[#allocation2 + $0x8] sm:$0xf] %v253_v12  ;;  %v366_v16 = vld [vmem:[%s829_s19 + $0x8] sm:$0xf] }
  0x17   : > { %284 = vrot.lane.b32.xlu0 %v276_v10, %s771_s21  ;;  %264 = vrot.lane.b32.xlu1 %v295_v6, %s772_s22  ;;  %v322_v17 = vld [vmem:[%s829_s19 + $0x8] sm:$0xf] }
  0x18   : > { %v741_v18 = vld [vmem:[%s829_s19 + $0x8] ss:$0 sps:$4 sm:$0xff]  }
  0x19   : > { %v405_v19 = vld [vmem:[%s829_s19 + $0x8] sm:$0xf] }
  0x1b   : > { %302 = vrot.lane.b32.xlu0 %v299_v9, %s770_s20  ;;  %282 = vrot.lane.b32.xlu1 %v299_v9, %s771_s21 }
  0x1f   : > { %266 = vrot.lane.b32.xlu0 %v740_v13, %s772_s22  ;;  %280 = vrot.lane.b32.xlu1 %v295_v6, %s771_s21 }
  0x23   : > { %346 = vrot.lane.b32.xlu1 %v299_v9, %s773_s23  ;;  %262 = vrot.lane.b32.xlu0 %v260_v14, %s772_s22 }
  0x27   : > { %344 = vrot.lane.b32.xlu1 %v295_v6, %s773_s23  ;;  %348 = vrot.lane.b32.xlu0 %v340_v15, %s773_s23 }
  0x2b   : > { %374 = vrot.lane.b32.xlu1 %v366_v16, %s774_s24  ;;  %372 = vrot.lane.b32.xlu0 %v299_v9, %s774_s24 }
  0x2f   : > { %330 = vrot.lane.b32.xlu1 %v322_v17, %s775_s25  ;;  %328 = vrot.lane.b32.xlu0 %v299_v9, %s775_s25 }
  0x33   : > { %393 = vrot.lane.b32.xlu1 %v295_v6, %s776_s26  ;;  %370 = vrot.lane.b32.xlu0 %v295_v6, %s774_s24 }
  0x37   : > { %326 = vrot.lane.b32.xlu1 %v295_v6, %s775_s25  ;;  %395 = vrot.lane.b32.xlu0 %v741_v18, %s776_s26 }
  0x3b   : > { %409 = vrot.lane.b32.xlu1 %v295_v6, %s777_s27  ;;  %391 = vrot.lane.b32.xlu0 %v260_v14, %s776_s26 }
  0x3f   : > { %413 = vrot.lane.b32.xlu1 %v405_v19, %s777_s27  ;;  %411 = vrot.lane.b32.xlu0 %v299_v9, %s777_s27 }
  0x43   : > { %578 = vperm.xlu0 %737, %v432_v21  }
  0x85   : > { %v305_v22 = vpop.permute.xlu0 %304  ;;  %v301_v23 = vpop.permute.xlu1 %300 }
  0x89   : > { %v285_v24 = vpop.permute.xlu0 %284  ;;  %v265_v25 = vpop.permute.xlu1 %264 }
  0x8d   : > { %v303_v27 = vpop.permute.xlu0 %302  ;;  %v283_v28 = vpop.permute.xlu1 %282 }
  0x8e   : > { %v307_v29 = vsel %vm306_vm2, %v301_v23, %v303_v27  ;;  %v308_v30 = vsel %vm306_vm2, %v303_v27, %v305_v22  ;;  %v288_v31 = vsel %vm286_vm3, %v283_v28, %v285_v24 }
  0x8f   : > { %v311_v32 = vsel %vm836_vm0, %v307_v29, 0.0  ;;  %v312_v33 = vsel %vm843_vm1, %v308_v30, 0.0  ;;  %v292_v34 = vsel %vm861_vm4, %v288_v31, 0.0 }
  0x90   : > { %v315_v35 = vrot.slane %v311_v32, 4  ;;  %v316_v36 = vrot.slane %v312_v33, 4  ;;  %294 = vst [vmem:[#allocation2 + $0x18] sm:$0xf] %v292_v34  ;;  %v743_v33 = vld [vmem:[%s927_s1 + $0x10] sm:$0xff]   ;;  %v744_v34 = vld [vmem:[%s927_s1 + $0x8] sm:$0xff]  }
  0x91   : > { %v267_v38 = vpop.permute.xlu0 %266  ;;  %v281_v39 = vpop.permute.xlu1 %280 }
  0x92   : > { %319 = vst [vmem:[#allocation2 + $0x10] sm:$0xf0] %v315_v35  ;;  %320 = vst [vmem:[#allocation2 + $0x18] sm:$0xf0] %v316_v36  ;;  %v270_v40 = vsel %vm268_vm5, %v265_v25, %v267_v38  ;;  %v287_v41 = vsel %vm286_vm3, %v281_v39, %v283_v28  ;;  %v745_v35 = vld [vmem:[%s927_s1 + $0x18] sm:$0xff]  }
  0x93   : > { %274 = vst [vmem:[#allocation2 + $0x8] sm:$0xf0] %v270_v40  ;;  %v291_v42 = vsel %vm874_vm6, %v287_v41, 0.0 }
  0x94   : > { %293 = vst [vmem:[#allocation2 + $0x10] sm:$0xf] %v291_v42 }
  0x95   : > { %v347_v43 = vpop.permute.xlu1 %346  ;;  %v263_v44 = vpop.permute.xlu0 %262 }
  0x96   : > { %v269_v45 = vsel %vm268_vm5, %v263_v44, %v265_v25 }
  0x97   : > { %273 = vst [vmem:[#allocation2] sm:$0xf0] %v269_v45 }
  0x99   : > { %v345_v46 = vpop.permute.xlu1 %344  ;;  %v349_v47 = vpop.permute.xlu0 %348  ;;  %v436_v48 = vld [vmem:[#allocation2 + $0x18] sm:$0xff] }
  0x9a   : > { %v351_v49 = vsel %vm350_vm7, %v345_v46, %v347_v43  ;;  %v352_v50 = vsel %vm350_vm7, %v347_v43, %v349_v47  ;;  %v434_v51 = vld [vmem:[#allocation2 + $0x8] sm:$0xff] }
  0x9b   : > { %v355_v52 = vsel %vm874_vm6, %v351_v49, 0.0  ;;  %v356_v53 = vsel %vm861_vm4, %v352_v50, 0.0  ;;  %v444_v54 = vpack.c.bf16 %v436_v48, %v434_v51  ;;  %v435_v61 = vld [vmem:[#allocation2 + $0x10] sm:$0xff] }
  0x9c   : > { %v359_v55 = vrot.slane %v355_v52, 4  ;;  %v360_v56 = vrot.slane %v356_v53, 4 }
  0x9d   : > { %v375_v57 = vpop.permute.xlu1 %374  ;;  %v373_v58 = vpop.permute.xlu0 %372  ;;  %489 = vmatprep.subr.bf16.mxu0 %v444_v54  ;;  %697 = vmatprep.subr.bf16.mxu1 %v444_v54 }
  0x9e   : > { %363 = vst [vmem:[#allocation2 + $0x20] sm:$0xf0] %v359_v55  ;;  %364 = vst [vmem:[#allocation2 + $0x28] sm:$0xf0] %v360_v56  ;;  %v378_v59 = vsel %vm376_vm8, %v373_v58, %v375_v57  ;;  %v433_v60 = vld [vmem:[#allocation2] sm:$0xff] }
  0x9f   : > { %v382_v62 = vsel %vm843_vm1, %v378_v59, 0.0  ;;  %v443_v63 = vpack.c.bf16 %v435_v61, %v433_v60 }
  0xa0   : > { %384 = vst [vmem:[#allocation2 + $0x38] sm:$0xf] %v382_v62 }
  0xa1   : > { %v331_v0 = vpop.permute.xlu1 %330  ;;  %v329_v1 = vpop.permute.xlu0 %328  ;;  %490 = vmatpush1.bf16.msra.mxu0 %v443_v63  ;;  %700 = vmatpush1.bf16.msra.mxu1 %v443_v63 }
  0xa2   : > { %v334_v2 = vsel %vm332_vm9, %v329_v1, %v331_v0 }
  0xa3   : > { %338 = vst [vmem:[#allocation2 + $0x28] sm:$0xf] %v334_v2 }
  0xa5   : > { %v394_v3 = vpop.permute.xlu1 %393  ;;  %v371_v4 = vpop.permute.xlu0 %370 }
  0xa6   : > { %v377_v5 = vsel %vm376_vm8, %v371_v4, %v373_v58 }
  0xa7   : > { %v381_v6 = vsel %vm836_vm0, %v377_v5, 0.0 }
  0xa8   : > { %383 = vst [vmem:[#allocation2 + $0x30] sm:$0xf] %v381_v6 }
  0xa9   : > { %v327_v8 = vpop.permute.xlu1 %326  ;;  %v396_v9 = vpop.permute.xlu0 %395 }
  0xaa   : > { %v333_v10 = vsel %vm332_vm9, %v327_v8, %v329_v1  ;;  %v399_v11 = vsel %vm397_vm10, %v394_v3, %v396_v9  ;;  %v438_v7 = vld [vmem:[#allocation2 + $0x28] sm:$0xff] }
  0xab   : > { %337 = vst [vmem:[#allocation2 + $0x20] sm:$0xf] %v333_v10  ;;  %403 = vst [vmem:[#allocation2 + $0x38] sm:$0xf0] %v399_v11 }
  0xad   : > { %v410_v12 = vpop.permute.xlu1 %409  ;;  %v392_v13 = vpop.permute.xlu0 %391 }
  0xae   : > { %v398_v14 = vsel %vm397_vm10, %v392_v13, %v394_v3 }
  0xaf   : > { %402 = vst [vmem:[#allocation2 + $0x30] sm:$0xf0] %v398_v14 }
  0xb1   : > { %v414_v15 = vpop.permute.xlu1 %413  ;;  %v412_v16 = vpop.permute.xlu0 %411 }
  0xb2   : > { %v416_v17 = vsel %vm415_vm11, %v410_v12, %v412_v16  ;;  %v417_v18 = vsel %vm415_vm11, %v412_v16, %v414_v15  ;;  %v440_v19 = vld [vmem:[#allocation2 + $0x38] sm:$0xff]  ;;  %v437_v24 = vld [vmem:[#allocation2 + $0x20] sm:$0xff] }
  0xb3   : > { %v420_v21 = vsel %vm874_vm6, %v416_v17, 0.0  ;;  %v421_v22 = vsel %vm861_vm4, %v417_v18, 0.0  ;;  %v446_v23 = vpack.c.bf16 %v440_v19, %v438_v7 }
  0xb4   : > { %422 = vst [vmem:[#allocation2 + $0x40] sm:$0xf] %v420_v21  ;;  %423 = vst [vmem:[#allocation2 + $0x48] sm:$0xf] %v421_v22 }
  0xb5   : > { %491 = vmatprep.subr.bf16.mxu0 %v446_v23  ;;  %698 = vmatprep.subr.bf16.mxu1 %v446_v23 }
  0xb6   : > { %v439_v25 = vld [vmem:[#allocation2 + $0x30] sm:$0xff] }
  0xb7   : > { %v445_v27 = vpack.c.bf16 %v439_v25, %v437_v24 }
  0xb9   : > { %492 = vmatpush1.bf16.msra.mxu0 %v445_v27  ;;  %701 = vmatpush1.bf16.msra.mxu1 %v445_v27 }
  0xbb   : > { %v442_v28 = vld [vmem:[#allocation2 + $0x48] sm:$0xf]  ;;  %v441_v29 = vld [vmem:[#allocation2 + $0x40] sm:$0xf] }
  0xbc   : > { %v448_v30 = vpack.c.bf16 %v442_v28, %v442_v28  ;;  %v447_v31 = vpack.c.bf16 %v441_v29, %v441_v29 }
  0xbe   : > { %689 = vmatprep.subr.msk.bf16.mxu0 %vm482_vm12, %v448_v30  ;;  %699 = vmatprep.subr.msk.bf16.mxu1 %vm482_vm12, %v448_v30  ;;  %v484_v32 = vsel %vm482_vm12, %v447_v31, 0 }
  0xbf   : > { %494 = vmatpush1.bf16.msra.mxu0 %v484_v32  ;;  %702 = vmatpush1.bf16.msra.mxu1 %v484_v32 }
  0xc2   : > { %690 = vmatmul.mubr.msk.bf16.vlgmr.msra.gmra.mrb[0].mxu0 %vm469_vm13, %v742_v26  ;;  %692 = vmatmul.mubr.msk.bf16.vlgmr.msra.gmra.mrb[0].mxu1 %vm469_vm13, %v743_v33  ;;  %v579_v63 = vpop.permute.xlu0 %578 }
  0xc3   : > { %531 = vmatprep.mubr.bf16.mxu0 %v778_v20  ;;  %551 = vmatprep.mubr.bf16.mxu1 %v778_v20 }
  0xca   : > { %691 = vmatmul.mubr.msk.bf16.gmra.mrb[4].mxu0 %vm469_vm13, %v744_v34  ;;  %693 = vmatmul.mubr.msk.bf16.gmra.mrb[4].mxu1 %vm469_vm13, %v745_v35 }
 0x195   : > { %v523_v36 = vpop.f32.mrb[0].mxu0  ;;  %v543_v37 = vpop.f32.mrb[0].mxu1 }
 0x196   : > { %v525_v38 = vpop.f32.mrb[1].mxu0  ;;  %v545_v39 = vpop.f32.mrb[1].mxu1 }
 0x197   : > { %v527_v40 = vpop.f32.mrb[2].mxu0  ;;  %v547_v41 = vpop.f32.mrb[2].mxu1 }
 0x198   : > { %v562_v42 = vmax.f32 %v523_v36, %v527_v40  ;;  %v529_v43 = vpop.f32.mrb[3].mxu0  ;;  %v549_v44 = vpop.f32.mrb[3].mxu1 }
 0x199   : > { %v563_v20 = vmax.f32 %v525_v38, %v529_v43 }
 0x19d   : > { %v533_v45 = vpop.f32.mrb[4].mxu0  ;;  %v553_v46 = vpop.f32.mrb[4].mxu1 }
 0x19e   : > { %v564_v47 = vmax.f32 %v562_v42, %v533_v45  ;;  %v535_v48 = vpop.f32.mrb[5].mxu0  ;;  %v555_v49 = vpop.f32.mrb[5].mxu1 }
 0x19f   : > { %v565_v50 = vmax.f32 %v563_v20, %v535_v48  ;;  %v537_v51 = vpop.f32.mrb[6].mxu0  ;;  %v557_v52 = vpop.f32.mrb[6].mxu1 }
 0x1a0   : > { %v566_v53 = vmax.f32 %v564_v47, %v537_v51  ;;  %v539_v54 = vpop.f32.mrb[7].mxu0  ;;  %v559_v55 = vpop.f32.mrb[7].mxu1 }
 0x1a1   : > { %v567_v56 = vmax.f32 %v565_v50, %v539_v54 }
 0x1a2   : > { %v568_v57 = vmax.f32 %v566_v53, %v543_v37 }
 0x1a3   : > { %v569_v58 = vmax.f32 %v567_v56, %v545_v39 }
 0x1a4   : > { %v570_v59 = vmax.f32 %v568_v57, %v547_v41 }
 0x1a5   : > { %v571_v60 = vmax.f32 %v569_v58, %v549_v44 }
 0x1a6   : > { %v572_v61 = vmax.f32 %v570_v59, %v553_v46 }
 0x1a7   : > { %v573_v62 = vmax.f32 %v571_v60, %v555_v49 }
 0x1a8   : > { %v574_v0 = vmax.f32 %v572_v61, %v557_v52 }
 0x1a9   : > { %v575_v1 = vmax.f32 %v573_v62, %v559_v55 }
 0x1aa   : > { %v581_v2 = vadd.f32 %v579_v63, %v574_v0 }
 0x1ab   : > { %v582_v3 = vadd.f32 %v579_v63, %v575_v1 }
 0x1ac   : > { %v583_v4 = vmax.f32 %v581_v2, 0.0 }
 0x1ad   : > { %v584_v5 = vmax.f32 %v582_v3, 0.0 }
 0x1ae   : > { %585 = vst [vmem:[%s206_s18] sm:$0xff] %v583_v4 }
 0x1af   : > { %586 = vst [vmem:[%s206_s18 + $0x8] sm:$0xff] %v584_v5 }
 0x1b0 PF: > { %s13_s14 = sadd.s32 1, %s768_s14   ;;  %s938_s12 = smov %s764_s13 }
 0x1b1   : > { %p10_p5 = scmp.ge.s32.totalorder %s13_s14, 4   ;;  %s939_s13 = smov %s941_s15 }
 0x1b3   :  { %12 = sbr.rel (!%p10_p5) target bundleno = 2 (0x2), region = 62 }

</bundles_post_ra>
